<compile_context>
chip_gen: v5e
topology: v5e:2x2
jax: 0.10.0
libtpu: 0.0.40
codegen_flags: <defaults>
</compile_context>

<pallas_src>
import jax
import jax.numpy as jnp
from jax.experimental import pallas as pl
from jax.experimental.pallas import tpu as pltpu


def _round_up(x, m):
    return -(-x // m) * m


def _vmem_capacity_bytes():
    try:
        return int(pltpu.get_tpu_info().vmem_capacity_bytes)
    except Exception:
        return 64 * 1024 * 1024          # conservative: v7x physical VMEM


def _num_tensorcores():
    # TODO(synk): query the TensorCore count from pltpu.get_tpu_info() once it
    # is exposed; for now key off the device kind (v7x = 2 TCs, v5e/v6e = 1).
    try:
        kind = jax.devices()[0].device_kind.lower()
    except Exception:
        return 1
    return 2 if "7" in kind else 1


def mask_gradient_loss(predict, target):
    """Pallas implementation of Mask_GradientLoss.forward for NCHW inputs.

        loss = mean_{maskx}|gradx(pred) - gradx(targ)|
             + mean_{masky}|grady(pred) - grady(targ)|
        maskx = (targ[..., 1:, :] != 0), masky = (targ[..., 1:] != 0)

    Preconditions (same as the torch reference): H >= 2, W >= 2; an all-zero
    target produces NaN (division by a zero count), matching PyTorch.
    """
    assert predict.shape == target.shape
    N, C, H, W = predict.shape
    assert H >= 2 and W >= 2, "Mask_GradientLoss needs H >= 2 and W >= 2"

    B = N * C
    L = H * W
    L_pad = _round_up(L, 128)            # lane-dense minor dim
    itemsize = jnp.dtype(predict.dtype).itemsize

    # ---- chip-aware tile selection (padded-footprint accounting) -----------
    vmem = _vmem_capacity_bytes()
    # 2 inputs x 2 pipeline buffers of one block must stay well inside VMEM:
    # cap each block at min(8 MiB, vmem/8)  ->  <= vmem/2 total for inputs.
    block_budget = min(8 * 1024 * 1024, vmem // 8)
    row_bytes = L_pad * itemsize
    # The lane axis is never tiled: each block row must hold a complete image
    # so both gradients stay inside one row (this is the correctness invariant).
    assert 8 * row_bytes <= block_budget, (
        "image too large for a single lane-resident row "
        f"(H*W={L} -> {L_pad} lanes)"
    )  # TODO(synk): add a lane-tiling axis (with boundary handling) for huge images.
    tb_cap = (block_budget // row_bytes) // 8 * 8      # images per block, 8-aligned

    b_min = _round_up(B, 8)                            # sublane-aligned batch
    if b_min <= tb_cap:
        tb, n_blocks = b_min, 1
    else:
        tb = tb_cap
        n_blocks = -(-b_min // tb)

    # Split the outer axis only when there are >= 2 TensorCores AND >= 2 blocks.
    n_outer = 2 if (_num_tensorcores() >= 2 and n_blocks >= 2) else 1
    n_inner = -(-n_blocks // n_outer)
    b_pad = n_outer * n_inner * tb

    # ---- lane-dense flattening: one image per row, H*W along lanes ---------
    # Zero padding (extra rows or extra lanes) is exact: zero target => mask 0
    # => contributes nothing to sums or counts.
    p2 = predict.reshape(B, L)
    t2 = target.reshape(B, L)
    if b_pad > B or L_pad > L:
        pad = ((0, b_pad - B), (0, L_pad - L))
        p2 = jnp.pad(p2, pad)
        t2 = jnp.pad(t2, pad)

    def kernel(pred_ref, targ_ref, acc_ref):
        @pl.when(pl.program_id(1) == 0)
        def _():
            acc_ref[...] = jnp.zeros_like(acc_ref)

        p = pred_ref[...].astype(jnp.float32)          # (tb, L_pad)
        t = targ_ref[...].astype(jnp.float32)
        d = p - t
        tnz = t != 0.0                                 # shared "later pixel" mask
        cnt = tnz.astype(jnp.float32)                  # one count feeds both dirs

        # Gradient along H: pair (l, l-W) along the flattened lane axis.
        # Wrapped lanes l < W are exactly the rows the reference drops; they
        # are removed in the host-side per-lane reduction, not in the loop.
        dgx = d - pltpu.roll(d, W, axis=1)
        sx = jnp.where(tnz, jnp.abs(dgx), 0.0)
        # Gradient along W: pair (l, l-1); lanes with l % W == 0 dropped later.
        dgy = d - pltpu.roll(d, 1, axis=1)
        sy = jnp.where(tnz, jnp.abs(dgy), 0.0)

        upd = jnp.concatenate(
            [jnp.sum(sx, axis=0, keepdims=True),
             jnp.sum(sy, axis=0, keepdims=True),
             jnp.sum(cnt, axis=0, keepdims=True)],
            axis=0)                                    # (3, L_pad)
        acc_ref[...] += upd[None]

    out_shape = jax.ShapeDtypeStruct((n_outer, 3, L_pad), jnp.float32)

    cost = pl.CostEstimate(
        flops=14 * b_pad * L_pad,
        transcendentals=0,
        bytes_accessed=2 * b_pad * L_pad * itemsize + n_outer * 3 * L_pad * 4,
    )

    vmem_limit = max(32 * 1024 * 1024, min(96 * 1024 * 1024, (vmem * 3) // 4))

    acc = pl.pallas_call(
        kernel,
        out_shape=out_shape,
        grid_spec=pltpu.PrefetchScalarGridSpec(
            num_scalar_prefetch=0,
            grid=(n_outer, n_inner),
            in_specs=[
                pl.BlockSpec((tb, L_pad), lambda o, i: (o * n_inner + i, 0)),
                pl.BlockSpec((tb, L_pad), lambda o, i: (o * n_inner + i, 0)),
            ],
            out_specs=pl.BlockSpec((1, 3, L_pad), lambda o, i: (o, 0, 0)),
        ),
        compiler_params=pltpu.CompilerParams(
            dimension_semantics=("parallel", "arbitrary"),
            vmem_limit_bytes=vmem_limit,
        ),
        cost_estimate=cost,
    )(p2, t2)

    # ---- tiny host-side finish: drop invalid lanes, reduce, normalize ------
    acc = acc.sum(axis=0)                              # (3, L_pad) across cores
    lane = jnp.arange(L_pad)
    valid_x = (lane >= W) & (lane < L)                 # h >= 1 rows
    valid_y = ((lane % W) != 0) & (lane < L)           # w >= 1 cols
    sum_x = jnp.where(valid_x, acc[0], 0.0).sum()
    sum_y = jnp.where(valid_y, acc[1], 0.0).sum()
    cnt_x = jnp.where(valid_x, acc[2], 0.0).sum()
    cnt_y = jnp.where(valid_y, acc[2], 0.0).sum()
    return sum_x / cnt_x + sum_y / cnt_y


class MultipleLoss:
    """JAX equivalent of the PyTorch MultipleLoss wrapper (weighted sum)."""

    def __init__(self, losses, weight=None):
        self.losses = list(losses)
        self.weight = weight or [1.0 / len(self.losses)] * len(self.losses)

    def __call__(self, predict, target):
        total_loss = 0.0
        for weight, loss in zip(self.weight, self.losses):
            if weight < 0.0001:
                total_loss = total_loss + loss(predict) * weight
            else:
                total_loss = total_loss + loss(predict, target) * weight
        return total_loss


def _reference_mask_gradient_loss(predict, target):
    """Pure-JAX reference mirroring the PyTorch Mask_GradientLoss forward."""
    predict = predict.astype(jnp.float32)
    target = target.astype(jnp.float32)
    maskx = (target[..., 1:, :] != 0).astype(jnp.float32)
    masky = (target[..., 1:] != 0).astype(jnp.float32)
    pgx = predict[..., 1:, :] - predict[..., :-1, :]
    pgy = predict[..., 1:] - predict[..., :-1]
    tgx = target[..., 1:, :] - target[..., :-1, :]
    tgy = target[..., 1:] - target[..., :-1]
    lx = jnp.sum(jnp.abs(pgx - tgx) * maskx) / jnp.sum(maskx)
    ly = jnp.sum(jnp.abs(pgy - tgy) * masky) / jnp.sum(masky)
    return lx + ly


if __name__ == "__main__":
    key = jax.random.PRNGKey(0)
    k1, k2, k3 = jax.random.split(key, 3)
    N, C, H, W = 2, 4, 16, 16
    predict = jax.random.normal(k1, (N, C, H, W), dtype=jnp.float32)
    target = jax.random.normal(k2, (N, C, H, W), dtype=jnp.float32)
    # sprinkle exact zeros into target so the (!= 0) masks are non-trivial
    zero_mask = jax.random.uniform(k3, (N, C, H, W)) < 0.3
    target = jnp.where(zero_mask, 0.0, target)

    criterion = MultipleLoss([mask_gradient_loss])            # weight -> [1.0]
    loss = jax.block_until_ready(criterion(predict, target))

    ref = MultipleLoss([_reference_mask_gradient_loss])(predict, target)
    assert jnp.allclose(loss, ref, rtol=1e-5, atol=1e-5), (loss, ref)
    print("KERNEL_OK")
</pallas_src>

<mosaic_0001>
module attributes {stable_mosaic.version = 11 : i64} {
  func.func @kernel(%arg0: i32, %arg1: i32, %arg2: memref<8x256xf32, #tpu.memory_space<vmem>>, %arg3: memref<8x256xf32, #tpu.memory_space<vmem>>, %arg4: memref<1x3x256xf32, #tpu.memory_space<vmem>>) attributes {dimension_semantics = [#tpu.dimension_semantics<parallel>, #tpu.dimension_semantics<arbitrary>], iteration_bounds = array<i64: 1, 1>, scalar_prefetch = 0 : i64, scratch_operands = 0 : i64, tpu.core_type = #tpu.core_type<tc>, window_params = [{transform_indices = @transform_0, window_bounds = array<i64: 8, 256>}, {transform_indices = @transform_1, window_bounds = array<i64: 8, 256>}, {transform_indices = @transform_2, window_bounds = array<i64: 1, 3, 256>}]} {
    %c0_i32 = arith.constant 0 : i32
    %0 = arith.cmpi eq, %arg1, %c0_i32 : i32
    %1 = arith.extui %0 : i1 to i32
    %c0_i32_0 = arith.constant 0 : i32
    %2 = arith.cmpi ne, %1, %c0_i32_0 : i32
    scf.if %2 {
      %cst_15 = arith.constant 0.000000e+00 : f32
      %31 = vector.broadcast %cst_15 : f32 to vector<1x3x256xf32>
      %c0_16 = arith.constant 0 : index
      %c0_17 = arith.constant 0 : index
      %c0_18 = arith.constant 0 : index
      %32 = vector.load %arg4[%c0_16, %c0_17, %c0_18] : memref<1x3x256xf32, #tpu.memory_space<vmem>>, vector<1x3x256xf32>
      tpu.vector_store %arg4[%c0_16, %c0_17, %c0_18], %31 {strides = array<i32>} : memref<1x3x256xf32, #tpu.memory_space<vmem>>, vector<1x3x256xf32>,
    } else {
    }
    %c0 = arith.constant 0 : index
    %c0_1 = arith.constant 0 : index
    %3 = vector.load %arg2[%c0, %c0_1] : memref<8x256xf32, #tpu.memory_space<vmem>>, vector<8x256xf32>
    %c0_2 = arith.constant 0 : index
    %c0_3 = arith.constant 0 : index
    %4 = vector.load %arg3[%c0_2, %c0_3] : memref<8x256xf32, #tpu.memory_space<vmem>>, vector<8x256xf32>
    %5 = arith.subf %3, %4 : vector<8x256xf32>
    %cst = arith.constant 0.000000e+00 : f32
    %6 = vector.broadcast %cst : f32 to vector<8x256xf32>
    %7 = arith.cmpf one, %4, %6 : vector<8x256xf32>
    %8 = arith.extui %7 : vector<8x256xi1> to vector<8x256xi32>
    %9 = arith.sitofp %8 : vector<8x256xi32> to vector<8x256xf32>
    %c16_i32 = arith.constant 16 : i32
    %10 = tpu.dynamic_rotate %5 by %c16_i32 dim 1 : vector<8x256xf32>, i32 -> vector<8x256xf32>
    %11 = arith.subf %5, %10 : vector<8x256xf32>
    %12 = math.absf %11 : vector<8x256xf32>
    %cst_4 = arith.constant 0.000000e+00 : f32
    %13 = vector.broadcast %cst_4 : f32 to vector<8x256xf32>
    %14 = arith.select %7, %12, %13 : vector<8x256xi1>, vector<8x256xf32>
    %c1_i32 = arith.constant 1 : i32
    %15 = tpu.dynamic_rotate %5 by %c1_i32 dim 1 : vector<8x256xf32>, i32 -> vector<8x256xf32>
    %16 = arith.subf %5, %15 : vector<8x256xf32>
    %17 = math.absf %16 : vector<8x256xf32>
    %cst_5 = arith.constant 0.000000e+00 : f32
    %18 = vector.broadcast %cst_5 : f32 to vector<8x256xf32>
    %19 = arith.select %7, %17, %18 : vector<8x256xi1>, vector<8x256xf32>
    %cst_6 = arith.constant dense<0.000000e+00> : vector<256xf32>
    %20 = vector.multi_reduction <add>, %14, %cst_6 [0] : vector<8x256xf32> to vector<256xf32>
    %21 = vector.shape_cast %20 : vector<256xf32> to vector<1x256xf32>
    %cst_7 = arith.constant dense<0.000000e+00> : vector<256xf32>
    %22 = vector.multi_reduction <add>, %19, %cst_7 [0] : vector<8x256xf32> to vector<256xf32>
    %23 = vector.shape_cast %22 : vector<256xf32> to vector<1x256xf32>
    %cst_8 = arith.constant dense<0.000000e+00> : vector<256xf32>
    %24 = vector.multi_reduction <add>, %9, %cst_8 [0] : vector<8x256xf32> to vector<256xf32>
    %25 = vector.shape_cast %24 : vector<256xf32> to vector<1x256xf32>
    %26 = tpu.concatenate %21, %23, %25 in 0 : vector<1x256xf32>, vector<1x256xf32>, vector<1x256xf32> -> vector<3x256xf32>
    %c0_9 = arith.constant 0 : index
    %c0_10 = arith.constant 0 : index
    %c0_11 = arith.constant 0 : index
    %27 = vector.load %arg4[%c0_9, %c0_10, %c0_11] : memref<1x3x256xf32, #tpu.memory_space<vmem>>, vector<1x3x256xf32>
    %28 = vector.shape_cast %26 : vector<3x256xf32> to vector<1x3x256xf32>
    %29 = arith.addf %27, %28 : vector<1x3x256xf32>
    %c0_12 = arith.constant 0 : index
    %c0_13 = arith.constant 0 : index
    %c0_14 = arith.constant 0 : index
    %30 = vector.load %arg4[%c0_12, %c0_13, %c0_14] : memref<1x3x256xf32, #tpu.memory_space<vmem>>, vector<1x3x256xf32>
    tpu.vector_store %arg4[%c0_12, %c0_13, %c0_14], %29 {strides = array<i32>} : memref<1x3x256xf32, #tpu.memory_space<vmem>>, vector<1x3x256xf32>,
    return
  }
  func.func @transform_0(%arg0: i32, %arg1: i32) -> (i32, i32) {
    %c1_i32 = arith.constant 1 : i32
    %0 = arith.muli %arg0, %c1_i32 : i32
    %1 = arith.addi %0, %arg1 : i32
    %c0_i32 = arith.constant 0 : i32
    %c0_i32_0 = arith.constant 0 : i32
    return %1, %c0_i32 : i32, i32
  }
  func.func @transform_1(%arg0: i32, %arg1: i32) -> (i32, i32) {
    %c1_i32 = arith.constant 1 : i32
    %0 = arith.muli %arg0, %c1_i32 : i32
    %1 = arith.addi %0, %arg1 : i32
    %c0_i32 = arith.constant 0 : i32
    %c0_i32_0 = arith.constant 0 : i32
    return %1, %c0_i32 : i32, i32
  }
  func.func @transform_2(%arg0: i32, %arg1: i32) -> (i32, i32, i32) {
    %c0_i32 = arith.constant 0 : i32
    %c0_i32_0 = arith.constant 0 : i32
    %c0_i32_1 = arith.constant 0 : i32
    return %arg0, %c0_i32, %c0_i32_0 : i32, i32, i32
  }
}

</mosaic_0001>

<bundles_post_ra>
// kernel: tpu_custom_call.1
= control target key start
LH: loop header
LB: loop body
LE: loop exit
PB: predicated region body
PF: predicated region fallthrough
CT: control target
= control target key end

     0   :  { %7 = vsyncpa [#allocation3], 0  ;;  %s251_s0 = inlined_call_operand.hbm [shape: f32[8,256], index: 0, kind: input, shape index: {}]   ;;  %s252_s1 = inlined_call_operand.hbm [shape: f32[8,256], index: 1, kind: input, shape index: {}]   ;;  %s253_s2 = inlined_call_operand.vmem [shape: f32[1,3,256], index: 2, kind: output, shape index: {}]  }
   0x1   :  { %s18_s11 = sshll.u32 %s251_s0, 4  ;;  %s19_s11 = int_to_ptr.hbm [resolvable:$true] %s18_s11 }
   0x2   :  { %8 = vsyncpa [#allocation5], 0  ;;  %s210_s12 = smov [#allocation2]   ;;  %s33_s16 = sshll.u32 %s252_s1, 4  ;;  %s34_s16 = int_to_ptr.hbm [resolvable:$true] %s33_s16 }
   0x3   :  { %s20_s13 = sshll.u32 %s210_s12, 4  ;;  %s211_s17 = smov [#allocation4]   ;;  %s21_s13 = int_to_ptr.vmem [resolvable:$true] %s20_s13 }
   0x4   :  { %23 = dma.hbm_to_vmem [thread:$0]  %s19_s11, 256, %s21_s13, [#allocation3]  }
   0x5   :  { %s35_s18 = sshll.u32 %s211_s17, 4  ;;  %s36_s18 = int_to_ptr.vmem [resolvable:$true] %s35_s18 }
   0x6   :  { %38 = dma.hbm_to_vmem [thread:$0]  %s34_s16, 256, %s36_s18, [#allocation5]  }
   0x7   :  { %206 = dma.done.wait [#allocation3], 256  }
   0x8   :  { %207 = vsyncadd [#allocation3], 4294967040 }
   0x9   :  { %208 = dma.done.wait [#allocation5], 256  }
   0xa   :  { %209 = vsyncadd [#allocation5], 4294967040  ;;  %v212_v0 = vmov 0.0   ;;  %v54_v1 = vld [vmem:[#allocation2] sm:$0xff]  ;;  %v56_v2 = vld [vmem:[#allocation4] sm:$0xff]  ;;  %s213_s20 = smov 1   ;;  %v70_v7 = vlaneseq }
   0xb   :  { %53 = vst [vmem:[%s253_s2] sm:$0x77] %v212_v0  ;;  %v58_v3 = vsub.f32 %v54_v1, %v56_v2  ;;  %s214_s1 = smov 16   ;;  %v55_v4 = vld [vmem:[#allocation2 + $0x8] sm:$0xff]  ;;  %v57_v5 = vld [vmem:[#allocation4 + $0x8] sm:$0xff]  ;;  %vm60_vm1 = vcmp.ne.f32.partialorder %v56_v2, 0.0  ;;  %vm130_vm4 = vcmask 1040384  }
   0xc   :  { %v59_v6 = vsub.f32 %v55_v4, %v57_v5  ;;  %vm61_vm0 = vcmp.ne.f32.partialorder %v57_v5, 0.0  ;;  %v151_v11 = vsel %vm60_vm1, 1.0, %v212_v0  ;;  %v71_v12 = vand.u32 127, %v70_v7 }
   0xd   :  { %81 = vrot.lane.b32.xlu1 %v58_v3, %s213_s20  ;;  %66 = vrot.lane.b32.xlu0 %v58_v3, %s214_s1  ;;  %v152_v10 = vsel %vm61_vm0, 1.0, %v212_v0  ;;  %v118_v14 = vrot.slane %v151_v11, 4  ;;  %vm133_vm5 = vcmask 1041408   ;;  %vm140_vm6 = vcmask 1043456  }
   0xe   :  { %v124_v13 = vrot.slane %v152_v10, 4  ;;  %vm85_vm2 = vcmp.lt.s32.totalorder %v71_v12, 1  ;;  %vm72_vm3 = vcmp.lt.s32.totalorder %v71_v12, 16 }
   0xf   :  { %v119_v16 = vadd.f32 %v151_v11, %v118_v14 }
  0x10   :  { %v125_v15 = vadd.f32 %v152_v10, %v124_v13 }
  0x11   :  { %v120_v32 = vrot.slane %v119_v16, 2 }
  0x12   :  { %v126_v27 = vrot.slane %v125_v15, 2 }
  0x13   :  { %v121_v46 = vadd.f32 %v120_v32, %v119_v16 }
  0x14   :  { %v127_v40 = vadd.f32 %v126_v27, %v125_v15 }
  0x15   :  { %83 = vrot.lane.b32.xlu1 %v59_v6, %s213_s20  ;;  %68 = vrot.lane.b32.xlu0 %v59_v6, %s214_s1  ;;  %v122_v56 = vrot.slane %v121_v46, 1 }
  0x16   :  { %v128_v50 = vrot.slane %v127_v40, 1 }
  0x17   :  { %v123_v2 = vadd.f32 %v122_v56, %v121_v46 }
  0x18   :  { %v129_v60 = vadd.f32 %v128_v50, %v127_v40 }
  0x7f   :  { %v82_v8 = vpop.permute.xlu1 %81  ;;  %v67_v9 = vpop.permute.xlu0 %66 }
  0x87   :  { %v84_v17 = vpop.permute.xlu1 %83  ;;  %v69_v18 = vpop.permute.xlu0 %68 }
  0x88   :  { %v86_v19 = vsel %vm85_vm2, %v82_v8, %v84_v17  ;;  %v87_v20 = vsel %vm85_vm2, %v84_v17, %v82_v8  ;;  %v73_v21 = vsel %vm72_vm3, %v67_v9, %v69_v18  ;;  %v74_v22 = vsel %vm72_vm3, %v69_v18, %v67_v9 }
  0x89   :  { %v88_v23 = vsub.f32 %v58_v3, %v87_v20  ;;  %v89_v24 = vsub.f32 %v59_v6, %v86_v19  ;;  %v75_v25 = vsub.f32 %v58_v3, %v74_v22  ;;  %v76_v26 = vsub.f32 %v59_v6, %v73_v21  ;;  %v136_v6 = vld [vmem:[%s253_s2] sm:$0x77] }
  0x8b   :  { %v90_v28 = vand.u32 2147483647, %v88_v23  ;;  %v91_v29 = vand.u32 2147483647, %v89_v24  ;;  %v77_v30 = vand.u32 2147483647, %v75_v25 }
  0x8c   :  { %v78_v31 = vand.u32 2147483647, %v76_v26 }
  0x8d   :  { %v92_v33 = vsel %vm60_vm1, %v90_v28, 0.0  ;;  %v93_v34 = vsel %vm61_vm0, %v91_v29, 0.0  ;;  %v79_v35 = vsel %vm60_vm1, %v77_v30, 0.0 }
  0x8e   :  { %v106_v36 = vrot.slane %v92_v33, 4  ;;  %v112_v37 = vrot.slane %v93_v34, 4  ;;  %v80_v38 = vsel %vm61_vm0, %v78_v31, 0.0  ;;  %v94_v39 = vrot.slane %v79_v35, 4 }
  0x8f   :  { %v100_v41 = vrot.slane %v80_v38, 4 }
  0x90   :  { %v107_v42 = vadd.f32 %v106_v36, %v92_v33  ;;  %v113_v43 = vadd.f32 %v112_v37, %v93_v34  ;;  %v95_v44 = vadd.f32 %v94_v39, %v79_v35 }
  0x91   :  { %v101_v45 = vadd.f32 %v100_v41, %v80_v38 }
  0x92   :  { %v108_v47 = vrot.slane %v107_v42, 2  ;;  %v114_v48 = vrot.slane %v113_v43, 2  ;;  %v96_v49 = vrot.slane %v95_v44, 2 }
  0x93   :  { %v102_v51 = vrot.slane %v101_v45, 2 }
  0x94   :  { %v109_v52 = vadd.f32 %v108_v47, %v107_v42  ;;  %v115_v53 = vadd.f32 %v114_v48, %v113_v43  ;;  %v97_v54 = vadd.f32 %v96_v49, %v95_v44 }
  0x95   :  { %v103_v55 = vadd.f32 %v102_v51, %v101_v45 }
  0x96   :  { %v110_v57 = vrot.slane %v109_v52, 1  ;;  %v116_v58 = vrot.slane %v115_v53, 1  ;;  %v98_v59 = vrot.slane %v97_v54, 1 }
  0x97   :  { %v104_v61 = vrot.slane %v103_v55, 1 }
  0x98   :  { %v111_v62 = vadd.f32 %v110_v57, %v109_v52  ;;  %v117_v63 = vadd.f32 %v116_v58, %v115_v53  ;;  %v99_v0 = vadd.f32 %v98_v59, %v97_v54 }
  0x99   :  { %v105_v1 = vadd.f32 %v104_v61, %v103_v55 }
  0x9a   :  { %v131_v3 = vsel %vm130_vm4, %v99_v0, %v111_v62 }
  0x9b   :  { %v132_v4 = vsel %vm130_vm4, %v105_v1, %v117_v63  ;;  %v134_v8 = vsel %vm133_vm5, %v131_v3, %v123_v2 }
  0x9c   :  { %v135_v5 = vsel %vm133_vm5, %v132_v4, %v129_v60 }
  0x9d   :  { %v139_v7 = vrot.slane %v135_v5, 4 }
  0x9f   :  { %v141_v9 = vsel %vm140_vm6, %v134_v8, %v139_v7 }
  0xa0   :  { %v143_v10 = vadd.f32 %v141_v9, %v136_v6 }
  0xa2   :  { %144 = vst [vmem:[%s253_s2] sm:$0x77] %v143_v10 }
  0xa3   :  { %149 = vsyncpa [#allocation3], 1 }
  0xa4   :  { %150 = vsyncpa [#allocation5], 1 }

</bundles_post_ra>
